<compile_context>
chip_gen: v5e
topology: v5e:2x2
jax: 0.10.0
libtpu: 0.0.40
codegen_flags: <defaults>
</compile_context>

<pallas_src>
import math

import jax
import jax.numpy as jnp
from jax import lax
from jax.experimental import pallas as pl
from jax.experimental.pallas import tpu as pltpu


def _round_up(v, m):
    return ((v + m - 1) // m) * m


def _linear_bias_gelu_kernel(x_ref, w_ref, b_ref, o_ref, acc_ref):
    """One (tm, d_out_p) output tile; K (reduction) is the last grid axis."""
    k = pl.program_id(1)

    @pl.when(k == 0)
    def _init():
        acc_ref[...] = jnp.zeros_like(acc_ref)

    # MXU matmul in the native input dtype with f32 accumulation.
    acc_ref[...] += jnp.dot(
        x_ref[...], w_ref[...], preferred_element_type=jnp.float32
    )

    @pl.when(k == pl.num_programs(1) - 1)
    def _finalize():
        y = acc_ref[...] + b_ref[...].astype(jnp.float32)
        # Exact GELU (matches torch nn.GELU() default, approximate='none').
        g = 0.5 * y * (1.0 + lax.erf(y * jnp.float32(0.7071067811865476)))
        o_ref[...] = g.astype(o_ref.dtype)


def prepare_params(weight, bias):
    """Pad parameters to a lane-dense (multiple-of-128) output width, ONCE.

    Hoisted out of the per-call hot path so the full weight is not re-read /
    re-written in HBM on every forward just to pad it.
    Returns (weight_p (d_in, d_out_p), bias2d (1, d_out_p), d_out).
    """
    d_in, d_out = weight.shape
    d_out_p = _round_up(max(d_out, 1), 128)
    if d_out_p != d_out:
        weight = jnp.pad(weight, ((0, 0), (0, d_out_p - d_out)))
        bias = jnp.pad(bias, (0, d_out_p - d_out))
    return weight, bias.reshape(1, d_out_p), d_out


def _choose_tiles(m, d_in, d_out_p, x_item, w_item, o_item, budget):
    """Pick (tm, tk) so streamed tiles + resident weight + accumulator fit VMEM."""
    m8 = _round_up(max(m, 1), 8)

    def full_k_bytes(tm):
        return (2 * tm * d_in * x_item            # x tiles (double-buffered)
                + 1 * d_in * d_out_p * w_item     # resident weight (single-buffered)
                + d_out_p * 4                     # bias
                + 2 * tm * d_out_p * o_item       # out tiles (double-buffered)
                + tm * d_out_p * 4)               # f32 accumulator scratch

    # Preferred: whole reduction dim resident (weight stays in VMEM; n_k == 1).
    for tm in (1024, 512, 256, 128, 64, 32, 16, 8):
        tm = min(tm, m8)
        if full_k_bytes(tm) <= budget:
            return tm, d_in
    # Fallback for very large d_in / d_out_p: also tile the reduction dim
    # (weight is then streamed -> double-buffered).
    tm = min(256, m8)
    for tk in (2048, 1024, 512, 256, 128):
        need = (2 * tm * tk * x_item
                + 2 * tk * d_out_p * w_item
                + d_out_p * 4
                + 2 * tm * d_out_p * o_item
                + tm * d_out_p * 4)
        if need <= budget:
            return tm, tk
    return min(8, m8), 128  # last resort; let the compiler try


def simple_reg_multi_forward(x1, x2, weight_p, bias2d, d_out):
    """y = GELU(x1 @ W + b).  x2 is unused (as in the reference forward).

    x1:       (..., d_in) feature-last
    weight_p: (d_in, d_out_p) lane-padded (from prepare_params)
    bias2d:   (1, d_out_p)
    d_out:    true output width (lane padding sliced off at the end)
    """
    del x2  # unused in the reference forward (see TODO above)
    d_in, d_out_p = weight_p.shape
    lead_shape = x1.shape[:-1]
    m = 1
    for s in lead_shape:
        m *= s
    x_flat = x1.reshape(m, d_in)

    x_item = jnp.dtype(x_flat.dtype).itemsize
    w_item = jnp.dtype(weight_p.dtype).itemsize
    o_item = x_item

    # VMEM-budget-aware tiling (64 MiB/TC on v7x, 128 MiB on v5e/v6e).
    try:
        vmem_cap = int(pltpu.get_tpu_info().vmem_capacity_bytes)
    except Exception:
        vmem_cap = 64 * 2**20
    budget = int(0.70 * vmem_cap)

    tm, tk = _choose_tiles(m, d_in, d_out_p, x_item, w_item, o_item, budget)

    # Only the rare K-tiled fallback pads the reduction dim (zeros contribute
    # nothing to the accumulator); the common path pads NOTHING on x.
    d_in_p = _round_up(d_in, tk)
    if d_in_p != d_in:
        x_flat = jnp.pad(x_flat, ((0, 0), (0, d_in_p - d_in)))
        weight_p = jnp.pad(weight_p, ((0, d_in_p - d_in), (0, 0)))
    n_k = d_in_p // tk
    weight_resident = n_k == 1

    # No row padding: partial last M block handled by pl.cdiv + discarded OOB
    # output rows (their garbage inputs are never written back).
    grid = (pl.cdiv(m, tm), n_k)

    need_bytes = (2 * tm * tk * x_item + 2 * tk * d_out_p * w_item
                  + d_out_p * 4 + 2 * tm * d_out_p * o_item
                  + tm * d_out_p * 4)
    vmem_limit = int(min(vmem_cap, max(need_bytes + (8 << 20), 16 << 20)))

    cost = pl.CostEstimate(
        flops=2 * m * d_in * d_out_p,
        transcendentals=m * d_out_p,  # one erf per output element
        bytes_accessed=(m * d_in * x_item + d_in_p * d_out_p * w_item
                        + d_out_p * 4 + m * d_out_p * o_item),
    )

    def _call(single_buffer_const):
        const_kwargs = (
            {"pipeline_mode": pl.Buffered(1)} if single_buffer_const else {}
        )
        return pl.pallas_call(
            _linear_bias_gelu_kernel,
            out_shape=jax.ShapeDtypeStruct((m, d_out_p), x1.dtype),
            grid=grid,
            in_specs=[
                # x streams one (tm, tk) tile per grid step.
                pl.BlockSpec((tm, tk), lambda i, k: (i, k)),
                # weight: fully VMEM-resident (single-buffered) when the whole
                # reduction dim fits; otherwise streamed along K.
                pl.BlockSpec((tk, d_out_p), lambda i, k: (k, 0), **const_kwargs),
                # bias: constant tiny block.
                pl.BlockSpec((1, d_out_p), lambda i, k: (0, 0), **const_kwargs),
            ],
            out_specs=pl.BlockSpec((tm, d_out_p), lambda i, k: (i, 0)),
            scratch_shapes=[pltpu.VMEM((tm, d_out_p), jnp.float32)],
            compiler_params=pltpu.CompilerParams(
                dimension_semantics=("parallel", "arbitrary"),
                vmem_limit_bytes=vmem_limit,
            ),
            cost_estimate=cost,
        )(x_flat, weight_p, bias2d)

    if weight_resident:
        try:
            out = _call(True)
        except Exception:
            # pl.Buffered(1) unsupported in this environment: fall back to the
            # default double-buffered constant blocks (costs extra VMEM only).
            out = _call(False)
    else:
        out = _call(False)

    if d_out_p != d_out:
        out = out[:, :d_out]
    return out.reshape(*lead_shape, d_out)


if __name__ == "__main__":
    d_in, d_out = 32, 16
    batch, seq = 2, 8

    key = jax.random.PRNGKey(0)
    k_x1, k_x2, k_w, k_b = jax.random.split(key, 4)

    x1 = jax.random.normal(k_x1, (batch, seq, d_in), dtype=jnp.float32)
    x2 = jax.random.normal(k_x2, (batch, seq, d_in), dtype=jnp.float32)

    # Deterministic synthetic nn.Linear-style init: weight (d_out, d_in),
    # bias (d_out,); stored transposed (d_in, d_out) for the kernel.
    bound = 1.0 / math.sqrt(d_in)
    w_torch_layout = jax.random.uniform(
        k_w, (d_out, d_in), minval=-bound, maxval=bound, dtype=jnp.float32
    )
    weight = w_torch_layout.T  # (d_in, d_out)
    bias = jax.random.uniform(
        k_b, (d_out,), minval=-bound, maxval=bound, dtype=jnp.float32
    )

    # Parameter lane-padding hoisted out of the per-call hot path.
    weight_p, bias2d, d_out_real = prepare_params(weight, bias)

    y = simple_reg_multi_forward(x1, x2, weight_p, bias2d, d_out_real)
    jax.block_until_ready(y)

    # Cross-check against plain JAX (exact GELU, high-precision matmul).
    ref = jax.nn.gelu(
        jnp.dot(x1.reshape(-1, d_in), weight, precision=jax.lax.Precision.HIGHEST)
        + bias,
        approximate=False,
    ).reshape(batch, seq, d_out)
    assert y.shape == (batch, seq, d_out)
    # Tolerance covers whichever MXU f32 pass-count the backend picks for the
    # in-kernel matmul; real semantic bugs produce O(0.1) errors.
    assert jnp.allclose(y, ref, atol=2e-3, rtol=2e-3)

    print("KERNEL_OK")
</pallas_src>

<mosaic_0001>
module attributes {stable_mosaic.version = 11 : i64} {
  func.func @_linear_bias_gelu_kernel(%arg0: i32, %arg1: i32, %arg2: memref<16x32xf32, #tpu.memory_space<vmem>>, %arg3: memref<32x128xf32, #tpu.memory_space<vmem>>, %arg4: memref<1x128xf32, #tpu.memory_space<vmem>>, %arg5: memref<16x128xf32, #tpu.memory_space<vmem>>, %arg6: memref<16x128xf32, #tpu.memory_space<vmem>>) attributes {dimension_semantics = [#tpu.dimension_semantics<parallel>, #tpu.dimension_semantics<arbitrary>], iteration_bounds = array<i64: 1, 1>, scalar_prefetch = 0 : i64, scratch_operands = 1 : i64, tpu.core_type = #tpu.core_type<tc>, window_params = [{transform_indices = @transform_0, window_bounds = array<i64: 16, 32>}, {pipeline_mode = #tpu.pipeline_mode<synchronous>, transform_indices = @transform_1, window_bounds = array<i64: 32, 128>}, {pipeline_mode = #tpu.pipeline_mode<synchronous>, transform_indices = @transform_2, window_bounds = array<i64: 1, 128>}, {transform_indices = @transform_3, window_bounds = array<i64: 16, 128>}]} {
    %c0_i32 = arith.constant 0 : i32
    %0 = arith.cmpi eq, %arg1, %c0_i32 : i32
    %1 = arith.extui %0 : i1 to i32
    %c0_i32_0 = arith.constant 0 : i32
    %2 = arith.cmpi ne, %1, %c0_i32_0 : i32
    scf.if %2 {
      %cst_10 = arith.constant 0.000000e+00 : f32
      %12 = vector.broadcast %cst_10 : f32 to vector<16x128xf32>
      %c0_11 = arith.constant 0 : index
      %c0_12 = arith.constant 0 : index
      %13 = vector.load %arg6[%c0_11, %c0_12] : memref<16x128xf32, #tpu.memory_space<vmem>>, vector<16x128xf32>
      tpu.vector_store %arg6[%c0_11, %c0_12], %12 {strides = array<i32>} : memref<16x128xf32, #tpu.memory_space<vmem>>, vector<16x128xf32>,
    } else {
    }
    %c0 = arith.constant 0 : index
    %c0_1 = arith.constant 0 : index
    %3 = vector.load %arg6[%c0, %c0_1] : memref<16x128xf32, #tpu.memory_space<vmem>>, vector<16x128xf32>
    %c0_2 = arith.constant 0 : index
    %c0_3 = arith.constant 0 : index
    %4 = vector.load %arg2[%c0_2, %c0_3] : memref<16x32xf32, #tpu.memory_space<vmem>>, vector<16x32xf32>
    %c0_4 = arith.constant 0 : index
    %c0_5 = arith.constant 0 : index
    %5 = vector.load %arg3[%c0_4, %c0_5] : memref<32x128xf32, #tpu.memory_space<vmem>>, vector<32x128xf32>
    %cst = arith.constant dense<0.000000e+00> : vector<16x128xf32>
    %6 = tpu.matmul %4, %5, %cst {dimension_numbers = #tpu.dot_dimension_numbers<[1], [0], [0], [1], [0, 0, 1, 1], [], []>} : vector<16x32xf32>, vector<32x128xf32>, vector<16x128xf32> -> vector<16x128xf32>
    %7 = arith.addf %3, %6 : vector<16x128xf32>
    %c0_6 = arith.constant 0 : index
    %c0_7 = arith.constant 0 : index
    %8 = vector.load %arg6[%c0_6, %c0_7] : memref<16x128xf32, #tpu.memory_space<vmem>>, vector<16x128xf32>
    tpu.vector_store %arg6[%c0_6, %c0_7], %7 {strides = array<i32>} : memref<16x128xf32, #tpu.memory_space<vmem>>, vector<16x128xf32>,
    %c0_i32_8 = arith.constant 0 : i32
    %9 = arith.cmpi eq, %arg1, %c0_i32_8 : i32
    %10 = arith.extui %9 : i1 to i32
    %c0_i32_9 = arith.constant 0 : i32
    %11 = arith.cmpi ne, %10, %c0_i32_9 : i32
    scf.if %11 {
      %c0_10 = arith.constant 0 : index
      %c0_11 = arith.constant 0 : index
      %12 = vector.load %arg6[%c0_10, %c0_11] : memref<16x128xf32, #tpu.memory_space<vmem>>, vector<16x128xf32>
      %c0_12 = arith.constant 0 : index
      %c0_13 = arith.constant 0 : index
      %13 = vector.load %arg4[%c0_12, %c0_13] : memref<1x128xf32, #tpu.memory_space<vmem>>, vector<1x128xf32>
      %14 = vector.broadcast %13 : vector<1x128xf32> to vector<16x128xf32>
      %15 = arith.addf %12, %14 : vector<16x128xf32>
      %cst_14 = arith.constant 5.000000e-01 : f32
      %16 = vector.broadcast %cst_14 : f32 to vector<16x128xf32>
      %17 = arith.mulf %16, %15 : vector<16x128xf32>
      %cst_15 = arith.constant 0.707106769 : f32
      %18 = vector.broadcast %cst_15 : f32 to vector<16x128xf32>
      %19 = arith.mulf %15, %18 : vector<16x128xf32>
      %20 = math.erf %19 : vector<16x128xf32>
      %cst_16 = arith.constant 1.000000e+00 : f32
      %21 = vector.broadcast %cst_16 : f32 to vector<16x128xf32>
      %22 = arith.addf %21, %20 : vector<16x128xf32>
      %23 = arith.mulf %17, %22 : vector<16x128xf32>
      %c0_17 = arith.constant 0 : index
      %c0_18 = arith.constant 0 : index
      %24 = vector.load %arg5[%c0_17, %c0_18] : memref<16x128xf32, #tpu.memory_space<vmem>>, vector<16x128xf32>
      tpu.vector_store %arg5[%c0_17, %c0_18], %23 {strides = array<i32>} : memref<16x128xf32, #tpu.memory_space<vmem>>, vector<16x128xf32>,
    } else {
    }
    return
  }
  func.func @transform_0(%arg0: i32, %arg1: i32) -> (i32, i32) {
    %c0_i32 = arith.constant 0 : i32
    return %arg0, %arg1 : i32, i32
  }
  func.func @transform_1(%arg0: i32, %arg1: i32) -> (i32, i32) {
    %c0_i32 = arith.constant 0 : i32
    %c0_i32_0 = arith.constant 0 : i32
    return %arg1, %c0_i32 : i32, i32
  }
  func.func @transform_2(%arg0: i32, %arg1: i32) -> (i32, i32) {
    %c0_i32 = arith.constant 0 : i32
    %c0_i32_0 = arith.constant 0 : i32
    %c0_i32_1 = arith.constant 0 : i32
    return %c0_i32, %c0_i32_0 : i32, i32
  }
  func.func @transform_3(%arg0: i32, %arg1: i32) -> (i32, i32) {
    %c0_i32 = arith.constant 0 : i32
    %c0_i32_0 = arith.constant 0 : i32
    return %arg0, %c0_i32 : i32, i32
  }
}

module attributes {stable_mosaic.version = 11 : i64} {
  func.func @_linear_bias_gelu_kernel(%arg0: i32, %arg1: i32, %arg2: memref<16x32xf32, #tpu.memory_space<vmem>>, %arg3: memref<32x128xf32, #tpu.memory_space<vmem>>, %arg4: memref<1x128xf32, #tpu.memory_space<vmem>>, %arg5: memref<16x128xf32, #tpu.memory_space<vmem>>, %arg6: memref<16x128xf32, #tpu.memory_space<vmem>>) attributes {dimension_semantics = [#tpu.dimension_semantics<parallel>, #tpu.dimension_semantics<arbitrary>], iteration_bounds = array<i64: 1, 1>, scalar_prefetch = 0 : i64, scratch_operands = 1 : i64, tpu.core_type = #tpu.core_type<tc>, window_params = [{transform_indices = @transform_0, window_bounds = array<i64: 16, 32>}, {transform_indices = @transform_1, window_bounds = array<i64: 32, 128>}, {pipeline_mode = #tpu.pipeline_mode<synchronous>, transform_indices = @transform_2, window_bounds = array<i64: 1, 128>}, {transform_indices = @transform_3, window_bounds = array<i64: 16, 128>}]} {
    %c0_i32 = arith.constant 0 : i32
    %0 = arith.cmpi eq, %arg1, %c0_i32 : i32
    %1 = arith.extui %0 : i1 to i32
    %c0_i32_0 = arith.constant 0 : i32
    %2 = arith.cmpi ne, %1, %c0_i32_0 : i32
    scf.if %2 {
      %cst_10 = arith.constant 0.000000e+00 : f32
      %12 = vector.broadcast %cst_10 : f32 to vector<16x128xf32>
      %c0_11 = arith.constant 0 : index
      %c0_12 = arith.constant 0 : index
      %13 = vector.load %arg6[%c0_11, %c0_12] : memref<16x128xf32, #tpu.memory_space<vmem>>, vector<16x128xf32>
      tpu.vector_store %arg6[%c0_11, %c0_12], %12 {strides = array<i32>} : memref<16x128xf32, #tpu.memory_space<vmem>>, vector<16x128xf32>,
    } else {
    }
    %c0 = arith.constant 0 : index
    %c0_1 = arith.constant 0 : index
    %3 = vector.load %arg6[%c0, %c0_1] : memref<16x128xf32, #tpu.memory_space<vmem>>, vector<16x128xf32>
    %c0_2 = arith.constant 0 : index
    %c0_3 = arith.constant 0 : index
    %4 = vector.load %arg2[%c0_2, %c0_3] : memref<16x32xf32, #tpu.memory_space<vmem>>, vector<16x32xf32>
    %c0_4 = arith.constant 0 : index
    %c0_5 = arith.constant 0 : index
    %5 = vector.load %arg3[%c0_4, %c0_5] : memref<32x128xf32, #tpu.memory_space<vmem>>, vector<32x128xf32>
    %cst = arith.constant dense<0.000000e+00> : vector<16x128xf32>
    %6 = tpu.matmul %4, %5, %cst {dimension_numbers = #tpu.dot_dimension_numbers<[1], [0], [0], [1], [0, 0, 1, 1], [], []>} : vector<16x32xf32>, vector<32x128xf32>, vector<16x128xf32> -> vector<16x128xf32>
    %7 = arith.addf %3, %6 : vector<16x128xf32>
    %c0_6 = arith.constant 0 : index
    %c0_7 = arith.constant 0 : index
    %8 = vector.load %arg6[%c0_6, %c0_7] : memref<16x128xf32, #tpu.memory_space<vmem>>, vector<16x128xf32>
    tpu.vector_store %arg6[%c0_6, %c0_7], %7 {strides = array<i32>} : memref<16x128xf32, #tpu.memory_space<vmem>>, vector<16x128xf32>,
    %c0_i32_8 = arith.constant 0 : i32
    %9 = arith.cmpi eq, %arg1, %c0_i32_8 : i32
    %10 = arith.extui %9 : i1 to i32
    %c0_i32_9 = arith.constant 0 : i32
    %11 = arith.cmpi ne, %10, %c0_i32_9 : i32
    scf.if %11 {
      %c0_10 = arith.constant 0 : index
      %c0_11 = arith.constant 0 : index
      %12 = vector.load %arg6[%c0_10, %c0_11] : memref<16x128xf32, #tpu.memory_space<vmem>>, vector<16x128xf32>
      %c0_12 = arith.constant 0 : index
      %c0_13 = arith.constant 0 : index
      %13 = vector.load %arg4[%c0_12, %c0_13] : memref<1x128xf32, #tpu.memory_space<vmem>>, vector<1x128xf32>
      %14 = vector.broadcast %13 : vector<1x128xf32> to vector<16x128xf32>
      %15 = arith.addf %12, %14 : vector<16x128xf32>
      %cst_14 = arith.constant 5.000000e-01 : f32
      %16 = vector.broadcast %cst_14 : f32 to vector<16x128xf32>
      %17 = arith.mulf %16, %15 : vector<16x128xf32>
      %cst_15 = arith.constant 0.707106769 : f32
      %18 = vector.broadcast %cst_15 : f32 to vector<16x128xf32>
      %19 = arith.mulf %15, %18 : vector<16x128xf32>
      %20 = math.erf %19 : vector<16x128xf32>
      %cst_16 = arith.constant 1.000000e+00 : f32
      %21 = vector.broadcast %cst_16 : f32 to vector<16x128xf32>
      %22 = arith.addf %21, %20 : vector<16x128xf32>
      %23 = arith.mulf %17, %22 : vector<16x128xf32>
      %c0_17 = arith.constant 0 : index
      %c0_18 = arith.constant 0 : index
      %24 = vector.load %arg5[%c0_17, %c0_18] : memref<16x128xf32, #tpu.memory_space<vmem>>, vector<16x128xf32>
      tpu.vector_store %arg5[%c0_17, %c0_18], %23 {strides = array<i32>} : memref<16x128xf32, #tpu.memory_space<vmem>>, vector<16x128xf32>,
    } else {
    }
    return
  }
  func.func @transform_0(%arg0: i32, %arg1: i32) -> (i32, i32) {
    %c0_i32 = arith.constant 0 : i32
    return %arg0, %arg1 : i32, i32
  }
  func.func @transform_1(%arg0: i32, %arg1: i32) -> (i32, i32) {
    %c0_i32 = arith.constant 0 : i32
    %c0_i32_0 = arith.constant 0 : i32
    return %arg1, %c0_i32 : i32, i32
  }
  func.func @transform_2(%arg0: i32, %arg1: i32) -> (i32, i32) {
    %c0_i32 = arith.constant 0 : i32
    %c0_i32_0 = arith.constant 0 : i32
    %c0_i32_1 = arith.constant 0 : i32
    return %c0_i32, %c0_i32_0 : i32, i32
  }
  func.func @transform_3(%arg0: i32, %arg1: i32) -> (i32, i32) {
    %c0_i32 = arith.constant 0 : i32
    %c0_i32_0 = arith.constant 0 : i32
    return %arg0, %c0_i32 : i32, i32
  }
}

</mosaic_0001>

<bundles_post_ra>
// kernel: tpu_custom_call.1
= control target key start
LH: loop header
LB: loop body
LE: loop exit
PB: predicated region body
PF: predicated region fallthrough
CT: control target
= control target key end

     0   :  { %8 = vsyncpa [#allocation4], 0  ;;  %s376_s0 = inlined_call_operand.hbm [shape: f32[16,32], index: 0, kind: input, shape index: {}]   ;;  %s377_s1 = inlined_call_operand.hbm [shape: f32[32,128], index: 1, kind: input, shape index: {}]   ;;  %s378_s2 = inlined_call_operand.vmem [shape: f32[1,128], index: 2, kind: input, shape index: {}]   ;;  %s379_s3 = inlined_call_operand.hbm [shape: f32[16,128], index: 3, kind: output, shape index: {}]  }
   0x1   :  { %9 = vsyncpa [#allocation7], 0 }
   0x2   :  { %10 = vsyncpa [#allocation5], 0  ;;  %s15_s14 = sshll.u32 %s376_s0, 4  ;;  %s312_s15 = smov [#allocation3]   ;;  %s16_s14 = int_to_ptr.hbm [resolvable:$true] %s15_s14 }
   0x3   :  { %s17_s16 = sshll.u32 %s312_s15, 4  ;;  %s28_s19 = sshll.u32 %s377_s1, 4  ;;  %s18_s16 = int_to_ptr.vmem [resolvable:$true] %s17_s16  ;;  %s29_s19 = int_to_ptr.hbm [resolvable:$true] %s28_s19 }
   0x4   :  { %s313_s20 = smov 128   ;;  %s314_s21 = smov 8  }
   0x5   :  { %23 = dma.hbm_to_vmem [thread:$0]  %s16_s14, 256, %s18_s16, [#allocation4], %s313_s20, %s313_s20, %s314_s21  }
   0x6   :  { %s315_s22 = smov [#allocation6]  }
   0x7   :  { %s30_s23 = sshll.u32 %s315_s22, 4  ;;  %s31_s23 = int_to_ptr.vmem [resolvable:$true] %s30_s23 }
   0x8   :  { %36 = dma.hbm_to_vmem [thread:$0]  %s29_s19, 512, %s31_s23, [#allocation7], %s313_s20, %s313_s20, %s314_s21  }
   0x9   :  { %306 = dma.done.wait [#allocation4], 256  }
   0xa   :  { %307 = vsyncadd [#allocation4], 4294967040 }
   0xb   :  { %308 = dma.done.wait [#allocation7], 512  }
   0xc   :  { %309 = vsyncadd [#allocation7], 4294966784  ;;  %v60_v0 = vld [vmem:[#allocation6 + $0x18] sm:$0xff]  ;;  %v59_v1 = vld [vmem:[#allocation6 + $0x10] sm:$0xff]  ;;  %vm61_vm0 = vcmask 261120   ;;  %s202_s27 = sshll.u32 %s379_s3, 4  ;;  %s203_s27 = int_to_ptr.hbm [resolvable:$true] %s202_s27 }
   0xd   :  { %80 = vmatpush.msra.mxu0 %v60_v0  ;;  %220 = vmatpush.msra.mxu1 %v60_v0  ;;  %v58_v2 = vld [vmem:[#allocation6 + $0x8] sm:$0xff]  ;;  %v57_v3 = vld [vmem:[#allocation6] sm:$0xff]  ;;  %v55_v4 = vld [vmem:[#allocation3] sm:$0xff] }
   0xe   :  { %v56_v5 = vld [vmem:[#allocation3 + $0x8] sm:$0xff]  ;;  %v229_v6 = vld [vmem:[%s378_s2] ss:$0 sm:$0xff]  ;;  %s316_s2 = smov [#allocation8]  }
   0xf   :  { %81 = vmatpush.msra.mxu0 %v59_v1  ;;  %221 = vmatpush.msra.mxu1 %v59_v1  ;;  %s200_s24 = sshll.u32 %s316_s2, 4  ;;  %s201_s24 = int_to_ptr.vmem [resolvable:$true] %s200_s24 }
  0x11   :  { %82 = vmatpush.msra.mxu0 %v58_v2  ;;  %222 = vmatpush.msra.mxu1 %v58_v2 }
  0x13   :  { %83 = vmatpush.msra.mxu0 %v57_v3  ;;  %223 = vmatpush.msra.mxu1 %v57_v3 }
  0x14   :  { %216 = vmatmul.msk.f32.vlgmr.msra.gmra.mxu0 %vm61_vm0, %v55_v4  ;;  %217 = vmatmul.msk.f32.vlgmr.msra.gmra.mxu1 %vm61_vm0, %v56_v5 }
  0x91   :  { %v85_v7 = vpop.f32.mrf.mxu0  ;;  %v88_v8 = vpop.f32.mrf.mxu1 }
  0x92   :  { %v352_v9 = vadd.f32 %v229_v6, %v85_v7  ;;  %v354_v10 = vadd.f32 %v229_v6, %v88_v8 }
  0x94   :  { %v357_v11 = vmul.f32 0.70710677, %v352_v9  ;;  %v360_v12 = vmul.f32 0.70710677, %v354_v10 }
  0x96   :  { %v110_v13 = vmul.f32 %v357_v11, %v357_v11  ;;  %v150_v14 = vmul.f32 %v360_v12, %v360_v12 }
  0x98   :  { %v111_v15 = vmin.f32 %v110_v13, 16.0  ;;  %v151_v16 = vmin.f32 %v150_v14, 16.0 }
  0x9a   :  { %v112_v17 = vmul.f32 2.1237322e-06, %v111_v15  ;;  %v123_v18 = vmul.f32 3.8918573e-05, %v111_v15  ;;  %v152_v19 = vmul.f32 2.1237322e-06, %v151_v16 }
  0x9b   :  { %v163_v20 = vmul.f32 3.8918573e-05, %v151_v16 }
  0x9c   :  { %v113_v21 = vadd.f32 0.00028619796, %v112_v17  ;;  %v124_v22 = vadd.f32 0.001143296, %v123_v18  ;;  %v153_v23 = vadd.f32 0.00028619796, %v152_v19 }
  0x9d   :  { %v164_v24 = vadd.f32 0.001143296, %v163_v20 }
  0x9e   :  { %v114_v25 = vmul.f32 %v113_v21, %v111_v15  ;;  %v125_v26 = vmul.f32 %v124_v22, %v111_v15  ;;  %v154_v27 = vmul.f32 %v153_v23, %v151_v16  ;;  %v106_v23 = vmul.f32 0.5, %v352_v9 }
  0x9f   :  { %v165_v28 = vmul.f32 %v164_v24, %v151_v16 }
  0xa0   :  { %v115_v29 = vadd.f32 0.0036580483, %v114_v25  ;;  %v126_v30 = vadd.f32 0.014752088, %v125_v26  ;;  %v155_v33 = vadd.f32 0.0036580483, %v154_v27 }
  0xa1   :  { %v166_v31 = vadd.f32 0.014752088, %v165_v28 }
  0xa2   :  { %v127_v32 = vmul.f32 %v126_v30, %v111_v15  ;;  %v116_v35 = vmul.f32 %v115_v29, %v111_v15  ;;  %v156_v39 = vmul.f32 %v155_v33, %v151_v16 }
  0xa3   :  { %v167_v34 = vmul.f32 %v166_v31, %v151_v16 }
  0xa4   :  { %v128_v36 = vadd.f32 0.112945676, %v127_v32  ;;  %v117_v41 = vadd.f32 0.05243302, %v116_v35  ;;  %v157_v45 = vadd.f32 0.05243302, %v156_v39 }
  0xa5   :  { %v168_v37 = vadd.f32 0.112945676, %v167_v34 }
  0xa6   :  { %v129_v38 = vmul.f32 %v128_v36, %v111_v15  ;;  %v118_v47 = vmul.f32 %v117_v41, %v111_v15  ;;  %v158_v50 = vmul.f32 %v157_v45, %v151_v16 }
  0xa7   :  { %v169_v40 = vmul.f32 %v168_v37, %v151_v16 }
  0xa8   :  { %v130_v42 = vadd.f32 0.4994258, %v129_v38  ;;  %v119_v51 = vadd.f32 0.18741608, %v118_v47  ;;  %v159_v52 = vadd.f32 0.18741608, %v158_v50 }
  0xa9   :  { %v170_v43 = vadd.f32 0.4994258, %v169_v40 }
  0xaa   :  { %v131_v44 = vmul.f32 %v130_v42, %v111_v15  ;;  %v120_v54 = vmul.f32 %v119_v51, %v111_v15  ;;  %v160_v57 = vmul.f32 %v159_v52, %v151_v16 }
  0xab   :  { %v171_v46 = vmul.f32 %v170_v43, %v151_v16 }
  0xac   :  { %v132_v48 = vadd.f32 1.0, %v131_v44  ;;  %v121_v60 = vadd.f32 1.1283791, %v120_v54  ;;  %v161_v2 = vadd.f32 1.1283791, %v160_v57 }
  0xad   :  { %v172_v49 = vadd.f32 1.0, %v171_v46 }
  0xae   :  { %230 = vrcp.f32 %v132_v48  ;;  %v144_v61 = vand.u32 2147483648, %v132_v48  ;;  %v142_v0 = vand.u32 2147483647, %v132_v48  ;;  %vm138_vm3 = vweird.f32 %v132_v48 }
  0xaf   :  { %232 = vrcp.f32 %v172_v49  ;;  %v184_v1 = vand.u32 2147483648, %v172_v49  ;;  %v182_v4 = vand.u32 2147483647, %v172_v49  ;;  %vm178_vm5 = vweird.f32 %v172_v49 }
  0xb0   :  { %v145_v6 = vor.u32 1.1754944e-38, %v144_v61  ;;  %v122_v8 = vmul.f32 %v121_v60, %v357_v11  ;;  %vm143_vm6 = vcmp.eq.f32.partialorder %v142_v0, 8.507059e+37  ;;  %v162_v16 = vmul.f32 %v161_v2, %v360_v12 }
  0xb1   :  { %v185_v14 = vor.u32 1.1754944e-38, %v184_v1  ;;  %vm183_vm8 = vcmp.eq.f32.partialorder %v182_v4, 8.507059e+37  ;;  %v107_v11 = vmul.f32 0.5, %v354_v10 }
  0xb4   :  { %v231_v53 = vpop.eup %230 }
  0xb5   :  { %v233_v55 = vpop.eup %232  ;;  %v134_v56 = vmul.f32 %v231_v53, %v132_v48  ;;  %vm139_vm1 = vweird.f32 %v231_v53 }
  0xb6   :  { %v174_v58 = vmul.f32 %v233_v55, %v172_v49  ;;  %vm179_vm2 = vweird.f32 %v233_v55  ;;  %vm140_vm4 = vmor %vm138_vm3, %vm139_vm1 }
  0xb7   :  { %v135_v59 = vsub.f32 1.0, %v134_v56  ;;  %vm180_vm7 = vmor %vm178_vm5, %vm179_vm2 }
  0xb8   :  { %v175_v62 = vsub.f32 1.0, %v174_v58 }
  0xb9   :  { %v136_v63 = vmul.f32 %v231_v53, %v135_v59 }
  0xba   :  { %v176_v3 = vmul.f32 %v233_v55, %v175_v62 }
  0xbb   :  { %v137_v5 = vadd.f32 %v231_v53, %v136_v63 }
  0xbc   :  { %v177_v7 = vadd.f32 %v233_v55, %v176_v3 }
  0xbd   :  { %v141_v13 = vsel %vm140_vm4, %v231_v53, %v137_v5 }
  0xbe   :  { %v146_v15 = vsel %vm143_vm6, %v145_v6, %v141_v13  ;;  %v181_v17 = vsel %vm180_vm7, %v233_v55, %v177_v7 }
  0xbf   :  { %v147_v18 = vmul.f32 %v146_v15, %v122_v8  ;;  %v186_v19 = vsel %vm183_vm8, %v185_v14, %v181_v17 }
  0xc0   :  { %v187_v20 = vmul.f32 %v186_v19, %v162_v16 }
  0xc1   :  { %v218_v21 = vclamps-f32 %v147_v18, 1.0 }
  0xc2   :  { %v219_v22 = vclamps-f32 %v187_v20, 1.0 }
  0xc3   :  { %v190_v24 = vadd.f32 1.0, %v218_v21 }
  0xc4   :  { %v191_v25 = vadd.f32 1.0, %v219_v22 }
  0xc5   :  { %v192_v12 = vmul.f32 %v190_v24, %v106_v23 }
  0xc6   :  { %v193_v26 = vmul.f32 %v191_v25, %v107_v11 }
  0xc7   :  { %194 = vst [vmem:[#allocation8] sm:$0xff] %v192_v12 }
  0xc8   :  { %195 = vst [vmem:[#allocation8 + $0x8] sm:$0xff] %v193_v26 }
  0xc9   :  { %208 = dma.vmem_to_hbm [thread:$0]  %s201_s24, 256, %s203_s27, [#allocation5], %s313_s20, %s313_s20, %s314_s21  }
  0xca   :  { %310 = dma.done.wait [#allocation5], 256  }
  0xcb   :  { %311 = vsyncadd [#allocation5], 4294967040 }
  0xcc   :  { %213 = vsyncpa [#allocation4], 1 }
  0xcd   :  { %214 = vsyncpa [#allocation7], 1 }
  0xce   :  { %215 = vsyncpa [#allocation5], 1 }

// kernel: tpu_custom_call.1
= control target key start
LH: loop header
LB: loop body
LE: loop exit
PB: predicated region body
PF: predicated region fallthrough
CT: control target
= control target key end

     0   :  { %8 = vsyncpa [#allocation4], 0  ;;  %s376_s0 = inlined_call_operand.hbm [shape: f32[16,32], index: 0, kind: input, shape index: {}]   ;;  %s377_s1 = inlined_call_operand.hbm [shape: f32[32,128], index: 1, kind: input, shape index: {}]   ;;  %s378_s2 = inlined_call_operand.vmem [shape: f32[1,128], index: 2, kind: input, shape index: {}]   ;;  %s379_s3 = inlined_call_operand.hbm [shape: f32[16,128], index: 3, kind: output, shape index: {}]  }
   0x1   :  { %9 = vsyncpa [#allocation7], 0 }
   0x2   :  { %10 = vsyncpa [#allocation5], 0  ;;  %s15_s14 = sshll.u32 %s376_s0, 4  ;;  %s312_s15 = smov [#allocation3]   ;;  %s16_s14 = int_to_ptr.hbm [resolvable:$true] %s15_s14 }
   0x3   :  { %s17_s16 = sshll.u32 %s312_s15, 4  ;;  %s28_s19 = sshll.u32 %s377_s1, 4  ;;  %s18_s16 = int_to_ptr.vmem [resolvable:$true] %s17_s16  ;;  %s29_s19 = int_to_ptr.hbm [resolvable:$true] %s28_s19 }
   0x4   :  { %s313_s20 = smov 128   ;;  %s314_s21 = smov 8  }
   0x5   :  { %23 = dma.hbm_to_vmem [thread:$0]  %s16_s14, 256, %s18_s16, [#allocation4], %s313_s20, %s313_s20, %s314_s21  }
   0x6   :  { %s315_s22 = smov [#allocation6]  }
   0x7   :  { %s30_s23 = sshll.u32 %s315_s22, 4  ;;  %s31_s23 = int_to_ptr.vmem [resolvable:$true] %s30_s23 }
   0x8   :  { %36 = dma.hbm_to_vmem [thread:$0]  %s29_s19, 512, %s31_s23, [#allocation7], %s313_s20, %s313_s20, %s314_s21  }
   0x9   :  { %306 = dma.done.wait [#allocation4], 256  }
   0xa   :  { %307 = vsyncadd [#allocation4], 4294967040 }
   0xb   :  { %308 = dma.done.wait [#allocation7], 512  }
   0xc   :  { %309 = vsyncadd [#allocation7], 4294966784  ;;  %v60_v0 = vld [vmem:[#allocation6 + $0x18] sm:$0xff]  ;;  %v59_v1 = vld [vmem:[#allocation6 + $0x10] sm:$0xff]  ;;  %vm61_vm0 = vcmask 261120   ;;  %s202_s27 = sshll.u32 %s379_s3, 4  ;;  %s203_s27 = int_to_ptr.hbm [resolvable:$true] %s202_s27 }
   0xd   :  { %80 = vmatpush.msra.mxu0 %v60_v0  ;;  %220 = vmatpush.msra.mxu1 %v60_v0  ;;  %v58_v2 = vld [vmem:[#allocation6 + $0x8] sm:$0xff]  ;;  %v57_v3 = vld [vmem:[#allocation6] sm:$0xff]  ;;  %v55_v4 = vld [vmem:[#allocation3] sm:$0xff] }
   0xe   :  { %v56_v5 = vld [vmem:[#allocation3 + $0x8] sm:$0xff]  ;;  %v229_v6 = vld [vmem:[%s378_s2] ss:$0 sm:$0xff]  ;;  %s316_s2 = smov [#allocation8]  }
   0xf   :  { %81 = vmatpush.msra.mxu0 %v59_v1  ;;  %221 = vmatpush.msra.mxu1 %v59_v1  ;;  %s200_s24 = sshll.u32 %s316_s2, 4  ;;  %s201_s24 = int_to_ptr.vmem [resolvable:$true] %s200_s24 }
  0x11   :  { %82 = vmatpush.msra.mxu0 %v58_v2  ;;  %222 = vmatpush.msra.mxu1 %v58_v2 }
  0x13   :  { %83 = vmatpush.msra.mxu0 %v57_v3  ;;  %223 = vmatpush.msra.mxu1 %v57_v3 }
  0x14   :  { %216 = vmatmul.msk.f32.vlgmr.msra.gmra.mxu0 %vm61_vm0, %v55_v4  ;;  %217 = vmatmul.msk.f32.vlgmr.msra.gmra.mxu1 %vm61_vm0, %v56_v5 }
  0x91   :  { %v85_v7 = vpop.f32.mrf.mxu0  ;;  %v88_v8 = vpop.f32.mrf.mxu1 }
  0x92   :  { %v352_v9 = vadd.f32 %v229_v6, %v85_v7  ;;  %v354_v10 = vadd.f32 %v229_v6, %v88_v8 }
  0x94   :  { %v357_v11 = vmul.f32 0.70710677, %v352_v9  ;;  %v360_v12 = vmul.f32 0.70710677, %v354_v10 }
  0x96   :  { %v110_v13 = vmul.f32 %v357_v11, %v357_v11  ;;  %v150_v14 = vmul.f32 %v360_v12, %v360_v12 }
  0x98   :  { %v111_v15 = vmin.f32 %v110_v13, 16.0  ;;  %v151_v16 = vmin.f32 %v150_v14, 16.0 }
  0x9a   :  { %v112_v17 = vmul.f32 2.1237322e-06, %v111_v15  ;;  %v123_v18 = vmul.f32 3.8918573e-05, %v111_v15  ;;  %v152_v19 = vmul.f32 2.1237322e-06, %v151_v16 }
  0x9b   :  { %v163_v20 = vmul.f32 3.8918573e-05, %v151_v16 }
  0x9c   :  { %v113_v21 = vadd.f32 0.00028619796, %v112_v17  ;;  %v124_v22 = vadd.f32 0.001143296, %v123_v18  ;;  %v153_v23 = vadd.f32 0.00028619796, %v152_v19 }
  0x9d   :  { %v164_v24 = vadd.f32 0.001143296, %v163_v20 }
  0x9e   :  { %v114_v25 = vmul.f32 %v113_v21, %v111_v15  ;;  %v125_v26 = vmul.f32 %v124_v22, %v111_v15  ;;  %v154_v27 = vmul.f32 %v153_v23, %v151_v16  ;;  %v106_v23 = vmul.f32 0.5, %v352_v9 }
  0x9f   :  { %v165_v28 = vmul.f32 %v164_v24, %v151_v16 }
  0xa0   :  { %v115_v29 = vadd.f32 0.0036580483, %v114_v25  ;;  %v126_v30 = vadd.f32 0.014752088, %v125_v26  ;;  %v155_v33 = vadd.f32 0.0036580483, %v154_v27 }
  0xa1   :  { %v166_v31 = vadd.f32 0.014752088, %v165_v28 }
  0xa2   :  { %v127_v32 = vmul.f32 %v126_v30, %v111_v15  ;;  %v116_v35 = vmul.f32 %v115_v29, %v111_v15  ;;  %v156_v39 = vmul.f32 %v155_v33, %v151_v16 }
  0xa3   :  { %v167_v34 = vmul.f32 %v166_v31, %v151_v16 }
  0xa4   :  { %v128_v36 = vadd.f32 0.112945676, %v127_v32  ;;  %v117_v41 = vadd.f32 0.05243302, %v116_v35  ;;  %v157_v45 = vadd.f32 0.05243302, %v156_v39 }
  0xa5   :  { %v168_v37 = vadd.f32 0.112945676, %v167_v34 }
  0xa6   :  { %v129_v38 = vmul.f32 %v128_v36, %v111_v15  ;;  %v118_v47 = vmul.f32 %v117_v41, %v111_v15  ;;  %v158_v50 = vmul.f32 %v157_v45, %v151_v16 }
  0xa7   :  { %v169_v40 = vmul.f32 %v168_v37, %v151_v16 }
  0xa8   :  { %v130_v42 = vadd.f32 0.4994258, %v129_v38  ;;  %v119_v51 = vadd.f32 0.18741608, %v118_v47  ;;  %v159_v52 = vadd.f32 0.18741608, %v158_v50 }
  0xa9   :  { %v170_v43 = vadd.f32 0.4994258, %v169_v40 }
  0xaa   :  { %v131_v44 = vmul.f32 %v130_v42, %v111_v15  ;;  %v120_v54 = vmul.f32 %v119_v51, %v111_v15  ;;  %v160_v57 = vmul.f32 %v159_v52, %v151_v16 }
  0xab   :  { %v171_v46 = vmul.f32 %v170_v43, %v151_v16 }
  0xac   :  { %v132_v48 = vadd.f32 1.0, %v131_v44  ;;  %v121_v60 = vadd.f32 1.1283791, %v120_v54  ;;  %v161_v2 = vadd.f32 1.1283791, %v160_v57 }
  0xad   :  { %v172_v49 = vadd.f32 1.0, %v171_v46 }
  0xae   :  { %230 = vrcp.f32 %v132_v48  ;;  %v144_v61 = vand.u32 2147483648, %v132_v48  ;;  %v142_v0 = vand.u32 2147483647, %v132_v48  ;;  %vm138_vm3 = vweird.f32 %v132_v48 }
  0xaf   :  { %232 = vrcp.f32 %v172_v49  ;;  %v184_v1 = vand.u32 2147483648, %v172_v49  ;;  %v182_v4 = vand.u32 2147483647, %v172_v49  ;;  %vm178_vm5 = vweird.f32 %v172_v49 }
  0xb0   :  { %v145_v6 = vor.u32 1.1754944e-38, %v144_v61  ;;  %v122_v8 = vmul.f32 %v121_v60, %v357_v11  ;;  %vm143_vm6 = vcmp.eq.f32.partialorder %v142_v0, 8.507059e+37  ;;  %v162_v16 = vmul.f32 %v161_v2, %v360_v12 }
  0xb1   :  { %v185_v14 = vor.u32 1.1754944e-38, %v184_v1  ;;  %vm183_vm8 = vcmp.eq.f32.partialorder %v182_v4, 8.507059e+37  ;;  %v107_v11 = vmul.f32 0.5, %v354_v10 }
  0xb4   :  { %v231_v53 = vpop.eup %230 }
  0xb5   :  { %v233_v55 = vpop.eup %232  ;;  %v134_v56 = vmul.f32 %v231_v53, %v132_v48  ;;  %vm139_vm1 = vweird.f32 %v231_v53 }
  0xb6   :  { %v174_v58 = vmul.f32 %v233_v55, %v172_v49  ;;  %vm179_vm2 = vweird.f32 %v233_v55  ;;  %vm140_vm4 = vmor %vm138_vm3, %vm139_vm1 }
  0xb7   :  { %v135_v59 = vsub.f32 1.0, %v134_v56  ;;  %vm180_vm7 = vmor %vm178_vm5, %vm179_vm2 }
  0xb8   :  { %v175_v62 = vsub.f32 1.0, %v174_v58 }
  0xb9   :  { %v136_v63 = vmul.f32 %v231_v53, %v135_v59 }
  0xba   :  { %v176_v3 = vmul.f32 %v233_v55, %v175_v62 }
  0xbb   :  { %v137_v5 = vadd.f32 %v231_v53, %v136_v63 }
  0xbc   :  { %v177_v7 = vadd.f32 %v233_v55, %v176_v3 }
  0xbd   :  { %v141_v13 = vsel %vm140_vm4, %v231_v53, %v137_v5 }
  0xbe   :  { %v146_v15 = vsel %vm143_vm6, %v145_v6, %v141_v13  ;;  %v181_v17 = vsel %vm180_vm7, %v233_v55, %v177_v7 }
  0xbf   :  { %v147_v18 = vmul.f32 %v146_v15, %v122_v8  ;;  %v186_v19 = vsel %vm183_vm8, %v185_v14, %v181_v17 }
  0xc0   :  { %v187_v20 = vmul.f32 %v186_v19, %v162_v16 }
  0xc1   :  { %v218_v21 = vclamps-f32 %v147_v18, 1.0 }
  0xc2   :  { %v219_v22 = vclamps-f32 %v187_v20, 1.0 }
  0xc3   :  { %v190_v24 = vadd.f32 1.0, %v218_v21 }
  0xc4   :  { %v191_v25 = vadd.f32 1.0, %v219_v22 }
  0xc5   :  { %v192_v12 = vmul.f32 %v190_v24, %v106_v23 }
  0xc6   :  { %v193_v26 = vmul.f32 %v191_v25, %v107_v11 }
  0xc7   :  { %194 = vst [vmem:[#allocation8] sm:$0xff] %v192_v12 }
  0xc8   :  { %195 = vst [vmem:[#allocation8 + $0x8] sm:$0xff] %v193_v26 }
  0xc9   :  { %208 = dma.vmem_to_hbm [thread:$0]  %s201_s24, 256, %s203_s27, [#allocation5], %s313_s20, %s313_s20, %s314_s21  }
  0xca   :  { %310 = dma.done.wait [#allocation5], 256  }
  0xcb   :  { %311 = vsyncadd [#allocation5], 4294967040 }
  0xcc   :  { %213 = vsyncpa [#allocation4], 1 }
  0xcd   :  { %214 = vsyncpa [#allocation7], 1 }
  0xce   :  { %215 = vsyncpa [#allocation5], 1 }

</bundles_post_ra>
